<compile_context>
chip_gen: v6e
topology: v6e:2x2x1
jax: 0.10.0
libtpu: 0.0.40
codegen_flags: <defaults>
</compile_context>

<pallas_src>
import functools
import math

import jax
import jax.numpy as jnp
from jax.experimental import pallas as pl
from jax.experimental.pallas import tpu as pltpu


def _round_up(x, m):
    return (x + m - 1) // m * m


def _sage_rowtile_kernel(a_ref, xk_ref, xr_ref, dinv_ref, pq_ref,
                         w1_ref, b1_ref, part_ref, acc_ref):
    """Row tile i, K tile k: accumulate A@X over k; emit a pooled partial at the last k."""
    k = pl.program_id(1)

    @pl.when(k == 0)
    def _init():
        acc_ref[...] = jnp.zeros_like(acc_ref)

    # int8 edge counts -> bf16 (exact for small integer counts), MXU matmul, f32 accumulation.
    a = a_ref[...].astype(jnp.bfloat16)
    acc_ref[...] += jnp.dot(a, xk_ref[...], preferred_element_type=jnp.float32)

    @pl.when(k == pl.num_programs(1) - 1)
    def _finish_row_tile():
        # Exact mean aggregation: scale the accumulated neighbor sum by 1/deg in f32.
        agg = (acc_ref[...] * dinv_ref[...]).astype(jnp.bfloat16)            # [tm, Cp]
        # Merged neighbor/root layer-1 matmul (lane concat is 128-aligned since Cp=128).
        cat = jnp.concatenate([agg, xr_ref[...]], axis=-1)                   # [tm, 2*Cp] bf16
        h1 = jnp.dot(cat, w1_ref[...], preferred_element_type=jnp.float32) + b1_ref[...]
        h1 = jnp.maximum(h1, 0.0)                                            # [tm, Hp] f32
        # Pooled layer-2 partial for this row tile (global_mean_pool folded in):
        #   rows [:Gp] -> (P @ A) @ h1 contribution, rows [Gp:] -> P @ h1 contribution.
        part_ref[0] = jnp.dot(pq_ref[...], h1, preferred_element_type=jnp.float32)


def _pool_finalize_kernel(part_ref, wl2_ref, wr2_ref, b2_ref, o_ref, acc_ref, *, cout, g_pad):
    """Sum per-row-tile pooled partials, fused layer-2 linear + masked log_softmax."""
    i = pl.program_id(0)

    @pl.when(i == 0)
    def _init():
        acc_ref[...] = jnp.zeros_like(acc_ref)

    acc_ref[...] += part_ref[0]

    @pl.when(i == pl.num_programs(0) - 1)
    def _finalize():
        acc = acc_ref[...]                                   # [2*Gp, Hp] f32
        agg, root = acc[:g_pad, :], acc[g_pad:, :]
        pooled = (jnp.dot(agg, wl2_ref[...], preferred_element_type=jnp.float32)
                  + jnp.dot(root, wr2_ref[...], preferred_element_type=jnp.float32)
                  + b2_ref[...])
        col = jax.lax.broadcasted_iota(jnp.int32, pooled.shape, 1)
        pooled = jnp.where(col < cout, pooled, -1e30)        # mask padded output columns
        m = jnp.max(pooled, axis=-1, keepdims=True)
        z = pooled - m
        lse = jnp.log(jnp.sum(jnp.exp(z), axis=-1, keepdims=True))
        o_ref[...] = z - lse


def graphsage_forward(x, edge_index, batch, params, num_graphs, *, tm=256, tk=1024):
    """Build dense adjacency / pooling matrices, pack padded weights, run the Pallas kernels."""
    # TODO(synk): for large sparse graphs, replace the dense adjacency with CSR row_ptr/col_idx
    # passed via scalar prefetch + manual DMA gather (O(E*C) instead of O(N^2*C)).
    n, cin = x.shape
    h = params["wl1"].shape[0]
    cout = params["wl2"].shape[0]

    assert tm % 128 == 0 and tk % 128 == 0, "tiles must be lane/MXU aligned"
    cp = _round_up(cin, 128)          # lane-dense channel padding
    hp = _round_up(h, 128)
    cop = _round_up(cout, 128)
    g_pad = _round_up(num_graphs, 8)  # full sublane for pooled rows / output block

    n128 = _round_up(n, 128)
    tm = min(tm, n128)
    tk = min(tk, n128)
    n_pad = _round_up(n, math.lcm(tm, tk))
    n_row_tiles = n_pad // tm

    src, dst = edge_index[0], edge_index[1]

    # Dense adjacency as raw int8 edge counts; mean-aggregation scale kept exact in f32.
    adj_cnt = jnp.zeros((n_pad, n_pad), jnp.float32).at[dst, src].add(1.0)
    deg_inv = 1.0 / jnp.maximum(jnp.sum(adj_cnt, axis=1, keepdims=True), 1.0)   # [n_pad, 1] f32
    adj_i8 = adj_cnt.astype(jnp.int8)

    # Mean-pool matrix P [Gp, n_pad], the fused PA = P @ A, stacked into one streamed array.
    onehot = (batch[None, :] == jnp.arange(num_graphs)[:, None]).astype(jnp.float32)
    onehot = jnp.pad(onehot, ((0, g_pad - num_graphs), (0, n_pad - n)))
    P = onehot / jnp.maximum(jnp.sum(onehot, axis=1, keepdims=True), 1.0)
    PA = P @ (adj_cnt * deg_inv)
    PQ = jnp.concatenate([PA, P], axis=0)             # [2*Gp, n_pad] f32 (exact normalization)

    # Node features, node- and channel-padded, bf16 for the streamed matmuls.
    Xp = jnp.zeros((n_pad, cp), jnp.float32).at[:n, :cin].set(x.astype(jnp.float32))
    X_bf = Xp.astype(jnp.bfloat16)

    # Packed + padded layer-1 weight [W_l^T ; W_r^T], pre-transposed to [in, out].
    w1 = jnp.zeros((2 * cp, hp), jnp.float32)
    w1 = w1.at[:cin, :h].set(params["wl1"].T).at[cp:cp + cin, :h].set(params["wr1"].T)
    w1_bf = w1.astype(jnp.bfloat16)
    b1 = jnp.zeros((1, hp), jnp.float32).at[0, :h].set(params["bl1"])
    wl2 = jnp.zeros((hp, cop), jnp.float32).at[:h, :cout].set(params["wl2"].T)
    wr2 = jnp.zeros((hp, cop), jnp.float32).at[:h, :cout].set(params["wr2"].T)
    b2 = jnp.zeros((1, cop), jnp.float32).at[0, :cout].set(params["bl2"])

    # ---- Kernel 1: row/K-tiled SAGE layer 1 + pooled layer-2 partials ----
    flops1 = (2 * n_pad * n_pad * cp                    # A @ X
              + 2 * n_pad * (2 * cp) * hp               # packed layer-1 matmul
              + 2 * (2 * g_pad) * n_pad * hp)           # pooled partial contraction
    bytes1 = (n_pad * n_pad                                        # int8 adjacency
              + n_row_tiles * n_pad * cp * 2 + n_pad * cp * 2      # X k-stream + X row tiles
              + 2 * g_pad * n_pad * 4 + n_pad * 4                  # PQ + deg_inv
              + (2 * cp * hp) * 2 + hp * 4                         # W1 + b1
              + n_row_tiles * 2 * g_pad * hp * 4)                  # pooled partials out
    partials = pl.pallas_call(
        _sage_rowtile_kernel,
        out_shape=jax.ShapeDtypeStruct((n_row_tiles, 2 * g_pad, hp), jnp.float32),
        grid_spec=pltpu.PrefetchScalarGridSpec(
            num_scalar_prefetch=0,
            grid=(n_row_tiles, n_pad // tk),
            in_specs=[
                pl.BlockSpec((tm, tk), lambda i, k: (i, k)),         # int8 adjacency tile
                pl.BlockSpec((tk, cp), lambda i, k: (k, 0)),         # X k-tile
                pl.BlockSpec((tm, cp), lambda i, k: (i, 0)),         # X row tile (root term)
                pl.BlockSpec((tm, 1), lambda i, k: (i, 0)),          # 1/deg (f32, exact)
                pl.BlockSpec((2 * g_pad, tm), lambda i, k: (0, i)),  # stacked [PA; P] tile
                pl.BlockSpec((2 * cp, hp), lambda i, k: (0, 0)),     # packed W1 (resident)
                pl.BlockSpec((1, hp), lambda i, k: (0, 0)),          # b1
            ],
            out_specs=pl.BlockSpec((1, 2 * g_pad, hp), lambda i, k: (i, 0, 0)),
            scratch_shapes=[pltpu.VMEM((tm, cp), jnp.float32)],
        ),
        # Each row tile writes only its own pooled partial -> row axis can be "parallel"
        # (uses both v7x TensorCores); the K axis is the A@X reduction ("arbitrary").
        compiler_params=pltpu.CompilerParams(
            dimension_semantics=("parallel", "arbitrary")),
        cost_estimate=pl.CostEstimate(flops=flops1, transcendentals=0,
                                      bytes_accessed=bytes1),
    )(adj_i8, X_bf, X_bf, deg_inv, PQ, w1_bf, b1)

    # ---- Kernel 2: tiny combine + fused layer-2 linear + masked log_softmax ----
    out = pl.pallas_call(
        functools.partial(_pool_finalize_kernel, cout=cout, g_pad=g_pad),
        out_shape=jax.ShapeDtypeStruct((g_pad, cop), jnp.float32),
        grid_spec=pltpu.PrefetchScalarGridSpec(
            num_scalar_prefetch=0,
            grid=(n_row_tiles,),
            in_specs=[
                pl.BlockSpec((1, 2 * g_pad, hp), lambda i: (i, 0, 0)),
                pl.BlockSpec((hp, cop), lambda i: (0, 0)),
                pl.BlockSpec((hp, cop), lambda i: (0, 0)),
                pl.BlockSpec((1, cop), lambda i: (0, 0)),
            ],
            out_specs=pl.BlockSpec((g_pad, cop), lambda i: (0, 0)),
            scratch_shapes=[pltpu.VMEM((2 * g_pad, hp), jnp.float32)],
        ),
        compiler_params=pltpu.CompilerParams(dimension_semantics=("arbitrary",)),
    )(partials, wl2, wr2, b2)

    return out[:num_graphs, :cout]


def init_params(key, channel_in, hidden, channel_out):
    ks = jax.random.split(key, 6)

    def lin(k, fan_in, fan_out):
        bound = 1.0 / jnp.sqrt(fan_in)
        return jax.random.uniform(k, (fan_out, fan_in), jnp.float32, -bound, bound)

    params = {
        "wl1": lin(ks[0], channel_in, hidden),
        "bl1": jax.random.uniform(ks[1], (hidden,), jnp.float32,
                                  -1.0 / jnp.sqrt(channel_in), 1.0 / jnp.sqrt(channel_in)),
        "wr1": lin(ks[2], channel_in, hidden),
        "wl2": lin(ks[3], hidden, channel_out),
        "bl2": jax.random.uniform(ks[4], (channel_out,), jnp.float32,
                                  -1.0 / jnp.sqrt(hidden), 1.0 / jnp.sqrt(hidden)),
        "wr2": lin(ks[5], hidden, channel_out),
    }
    # TODO(synk): self.lin1 in the PyTorch module is defined but never used in forward.
    return params


def _reference(x, edge_index, batch, params, num_graphs):
    """Pure-JAX f32 reference for validation."""
    n = x.shape[0]
    adj = jnp.zeros((n, n), jnp.float32).at[edge_index[1], edge_index[0]].add(1.0)
    A = adj / jnp.maximum(jnp.sum(adj, axis=1, keepdims=True), 1.0)
    h1 = jax.nn.relu(A @ x @ params["wl1"].T + params["bl1"] + x @ params["wr1"].T)
    h2 = A @ h1 @ params["wl2"].T + params["bl2"] + h1 @ params["wr2"].T
    onehot = (batch[None, :] == jnp.arange(num_graphs)[:, None]).astype(jnp.float32)
    P = onehot / jnp.maximum(jnp.sum(onehot, axis=1, keepdims=True), 1.0)
    pooled = P @ h2
    return jax.nn.log_softmax(pooled, axis=-1)


if __name__ == "__main__":
    channel_in, hidden, channel_out = 8, 32, 8
    nodes_per_graph, num_graphs = 128, 2
    num_nodes = nodes_per_graph * num_graphs   # 256 -> 2x2 (row, K) grid at tm=tk=128

    key = jax.random.PRNGKey(0)
    k_x, k_p = jax.random.split(key)

    x = jax.random.normal(k_x, (num_nodes, channel_in), jnp.float32)

    # Deterministic edges: a ring inside each graph (both directions), deg(i) == 2 everywhere.
    src, dst = [], []
    for g in range(num_graphs):
        base = g * nodes_per_graph
        for i in range(nodes_per_graph):
            a, b = base + i, base + (i + 1) % nodes_per_graph
            src += [a, b]
            dst += [b, a]
    edge_index = jnp.array([src, dst], dtype=jnp.int32)                           # [2, E]
    batch = jnp.repeat(jnp.arange(num_graphs, dtype=jnp.int32), nodes_per_graph)  # [N]

    params = init_params(k_p, channel_in, hidden, channel_out)

    # tm=tk=128 so both the row axis and the K-reduction axis are exercised (2x2 grid),
    # and kernel 2 accumulates two row-tile partials.
    out = graphsage_forward(x, edge_index, batch, params, num_graphs, tm=128, tk=128)
    out = jax.block_until_ready(out)

    ref = _reference(x, edge_index, batch, params, num_graphs)
    assert out.shape == (num_graphs, channel_out)
    # bf16 X / W1 operands (f32 accumulation, exact f32 normalization) vs f32 reference.
    assert jnp.allclose(out, ref, atol=5e-2, rtol=5e-2), "mismatch vs reference"

    print("KERNEL_OK")
</pallas_src>

<mosaic_0001>
module attributes {stable_mosaic.version = 11 : i64} {
  func.func @_sage_rowtile_kernel(%arg0: i32, %arg1: i32, %arg2: memref<128x128xi8, #tpu.memory_space<vmem>>, %arg3: memref<128x128xbf16, #tpu.memory_space<vmem>>, %arg4: memref<128x128xbf16, #tpu.memory_space<vmem>>, %arg5: memref<128x1xf32, #tpu.memory_space<vmem>>, %arg6: memref<16x128xf32, #tpu.memory_space<vmem>>, %arg7: memref<256x128xbf16, #tpu.memory_space<vmem>>, %arg8: memref<1x128xf32, #tpu.memory_space<vmem>>, %arg9: memref<1x16x128xf32, #tpu.memory_space<vmem>>, %arg10: memref<128x128xf32, #tpu.memory_space<vmem>>) attributes {dimension_semantics = [#tpu.dimension_semantics<parallel>, #tpu.dimension_semantics<arbitrary>], iteration_bounds = array<i64: 2, 2>, scalar_prefetch = 0 : i64, scratch_operands = 1 : i64, tpu.core_type = #tpu.core_type<tc>, window_params = [{transform_indices = @transform_0, window_bounds = array<i64: 128, 128>}, {transform_indices = @transform_1, window_bounds = array<i64: 128, 128>}, {transform_indices = @transform_2, window_bounds = array<i64: 128, 128>}, {transform_indices = @transform_3, window_bounds = array<i64: 128, 1>}, {transform_indices = @transform_4, window_bounds = array<i64: 16, 128>}, {pipeline_mode = #tpu.pipeline_mode<synchronous>, transform_indices = @transform_5, window_bounds = array<i64: 256, 128>}, {pipeline_mode = #tpu.pipeline_mode<synchronous>, transform_indices = @transform_6, window_bounds = array<i64: 1, 128>}, {transform_indices = @transform_7, window_bounds = array<i64: 1, 16, 128>}]} {
    %c0_i32 = arith.constant 0 : i32
    %0 = arith.cmpi eq, %arg1, %c0_i32 : i32
    %1 = arith.extui %0 : i1 to i32
    %c0_i32_0 = arith.constant 0 : i32
    %2 = arith.cmpi ne, %1, %c0_i32_0 : i32
    scf.if %2 {
      %cst_9 = arith.constant 0.000000e+00 : f32
      %13 = vector.broadcast %cst_9 : f32 to vector<128x128xf32>
      %c0_10 = arith.constant 0 : index
      %c0_11 = arith.constant 0 : index
      %14 = vector.load %arg10[%c0_10, %c0_11] : memref<128x128xf32, #tpu.memory_space<vmem>>, vector<128x128xf32>
      tpu.vector_store %arg10[%c0_10, %c0_11], %13 {strides = array<i32>} : memref<128x128xf32, #tpu.memory_space<vmem>>, vector<128x128xf32>,
    } else {
    }
    %c0 = arith.constant 0 : index
    %c0_1 = arith.constant 0 : index
    %3 = vector.load %arg2[%c0, %c0_1] : memref<128x128xi8, #tpu.memory_space<vmem>>, vector<128x128xi8>
    %4 = arith.sitofp %3 : vector<128x128xi8> to vector<128x128xbf16>
    %c0_2 = arith.constant 0 : index
    %c0_3 = arith.constant 0 : index
    %5 = vector.load %arg10[%c0_2, %c0_3] : memref<128x128xf32, #tpu.memory_space<vmem>>, vector<128x128xf32>
    %c0_4 = arith.constant 0 : index
    %c0_5 = arith.constant 0 : index
    %6 = vector.load %arg3[%c0_4, %c0_5] : memref<128x128xbf16, #tpu.memory_space<vmem>>, vector<128x128xbf16>
    %cst = arith.constant dense<0.000000e+00> : vector<128x128xf32>
    %7 = tpu.matmul %4, %6, %cst {dimension_numbers = #tpu.dot_dimension_numbers<[1], [0], [0], [1], [0, 0, 1, 1], [], []>} : vector<128x128xbf16>, vector<128x128xbf16>, vector<128x128xf32> -> vector<128x128xf32>
    %8 = arith.addf %5, %7 : vector<128x128xf32>
    %c0_6 = arith.constant 0 : index
    %c0_7 = arith.constant 0 : index
    %9 = vector.load %arg10[%c0_6, %c0_7] : memref<128x128xf32, #tpu.memory_space<vmem>>, vector<128x128xf32>
    tpu.vector_store %arg10[%c0_6, %c0_7], %8 {strides = array<i32>} : memref<128x128xf32, #tpu.memory_space<vmem>>, vector<128x128xf32>,
    %c1_i32 = arith.constant 1 : i32
    %10 = arith.cmpi eq, %arg1, %c1_i32 : i32
    %11 = arith.extui %10 : i1 to i32
    %c0_i32_8 = arith.constant 0 : i32
    %12 = arith.cmpi ne, %11, %c0_i32_8 : i32
    scf.if %12 {
      %c0_9 = arith.constant 0 : index
      %c0_10 = arith.constant 0 : index
      %13 = vector.load %arg10[%c0_9, %c0_10] : memref<128x128xf32, #tpu.memory_space<vmem>>, vector<128x128xf32>
      %c0_11 = arith.constant 0 : index
      %c0_12 = arith.constant 0 : index
      %14 = vector.load %arg5[%c0_11, %c0_12] : memref<128x1xf32, #tpu.memory_space<vmem>>, vector<128x1xf32>
      %15 = vector.broadcast %14 : vector<128x1xf32> to vector<128x128xf32>
      %16 = arith.mulf %13, %15 : vector<128x128xf32>
      %17 = arith.truncf %16 : vector<128x128xf32> to vector<128x128xbf16>
      %c0_13 = arith.constant 0 : index
      %c0_14 = arith.constant 0 : index
      %18 = vector.load %arg4[%c0_13, %c0_14] : memref<128x128xbf16, #tpu.memory_space<vmem>>, vector<128x128xbf16>
      %19 = tpu.concatenate %17, %18 in 1 : vector<128x128xbf16>, vector<128x128xbf16> -> vector<128x256xbf16>
      %c0_15 = arith.constant 0 : index
      %c0_16 = arith.constant 0 : index
      %20 = vector.load %arg7[%c0_15, %c0_16] : memref<256x128xbf16, #tpu.memory_space<vmem>>, vector<256x128xbf16>
      %cst_17 = arith.constant dense<0.000000e+00> : vector<128x128xf32>
      %21 = tpu.matmul %19, %20, %cst_17 {dimension_numbers = #tpu.dot_dimension_numbers<[1], [0], [0], [1], [0, 0, 1, 1], [], []>} : vector<128x256xbf16>, vector<256x128xbf16>, vector<128x128xf32> -> vector<128x128xf32>
      %c0_18 = arith.constant 0 : index
      %c0_19 = arith.constant 0 : index
      %22 = vector.load %arg8[%c0_18, %c0_19] : memref<1x128xf32, #tpu.memory_space<vmem>>, vector<1x128xf32>
      %23 = vector.broadcast %22 : vector<1x128xf32> to vector<128x128xf32>
      %24 = arith.addf %21, %23 : vector<128x128xf32>
      %cst_20 = arith.constant 0.000000e+00 : f32
      %25 = vector.broadcast %cst_20 : f32 to vector<128x128xf32>
      %26 = arith.maximumf %24, %25 : vector<128x128xf32>
      %c0_21 = arith.constant 0 : index
      %c0_22 = arith.constant 0 : index
      %27 = vector.load %arg6[%c0_21, %c0_22] : memref<16x128xf32, #tpu.memory_space<vmem>>, vector<16x128xf32>
      %cst_23 = arith.constant dense<0.000000e+00> : vector<16x128xf32>
      %28 = tpu.matmul %27, %26, %cst_23 {dimension_numbers = #tpu.dot_dimension_numbers<[1], [0], [0], [1], [0, 0, 1, 1], [], []>} : vector<16x128xf32>, vector<128x128xf32>, vector<16x128xf32> -> vector<16x128xf32>
      %c0_24 = arith.constant 0 : index
      %c0_25 = arith.constant 0 : index
      %c0_26 = arith.constant 0 : index
      %29 = vector.load %arg9[%c0_24, %c0_25, %c0_26] : memref<1x16x128xf32, #tpu.memory_space<vmem>>, vector<1x16x128xf32>
      %30 = vector.shape_cast %29 : vector<1x16x128xf32> to vector<16x128xf32>
      %31 = vector.shape_cast %28 : vector<16x128xf32> to vector<1x16x128xf32>
      tpu.vector_store %arg9[%c0_24, %c0_25, %c0_26], %31 {strides = array<i32>} : memref<1x16x128xf32, #tpu.memory_space<vmem>>, vector<1x16x128xf32>,
    } else {
    }
    return
  }
  func.func @transform_0(%arg0: i32, %arg1: i32) -> (i32, i32) {
    %c0_i32 = arith.constant 0 : i32
    return %arg0, %arg1 : i32, i32
  }
  func.func @transform_1(%arg0: i32, %arg1: i32) -> (i32, i32) {
    %c0_i32 = arith.constant 0 : i32
    %c0_i32_0 = arith.constant 0 : i32
    return %arg1, %c0_i32 : i32, i32
  }
  func.func @transform_2(%arg0: i32, %arg1: i32) -> (i32, i32) {
    %c0_i32 = arith.constant 0 : i32
    %c0_i32_0 = arith.constant 0 : i32
    return %arg0, %c0_i32 : i32, i32
  }
  func.func @transform_3(%arg0: i32, %arg1: i32) -> (i32, i32) {
    %c0_i32 = arith.constant 0 : i32
    %c0_i32_0 = arith.constant 0 : i32
    return %arg0, %c0_i32 : i32, i32
  }
  func.func @transform_4(%arg0: i32, %arg1: i32) -> (i32, i32) {
    %c0_i32 = arith.constant 0 : i32
    %c0_i32_0 = arith.constant 0 : i32
    return %c0_i32, %arg0 : i32, i32
  }
  func.func @transform_5(%arg0: i32, %arg1: i32) -> (i32, i32) {
    %c0_i32 = arith.constant 0 : i32
    %c0_i32_0 = arith.constant 0 : i32
    %c0_i32_1 = arith.constant 0 : i32
    return %c0_i32, %c0_i32_0 : i32, i32
  }
  func.func @transform_6(%arg0: i32, %arg1: i32) -> (i32, i32) {
    %c0_i32 = arith.constant 0 : i32
    %c0_i32_0 = arith.constant 0 : i32
    %c0_i32_1 = arith.constant 0 : i32
    return %c0_i32, %c0_i32_0 : i32, i32
  }
  func.func @transform_7(%arg0: i32, %arg1: i32) -> (i32, i32, i32) {
    %c0_i32 = arith.constant 0 : i32
    %c0_i32_0 = arith.constant 0 : i32
    %c0_i32_1 = arith.constant 0 : i32
    return %arg0, %c0_i32, %c0_i32_0 : i32, i32, i32
  }
}

</mosaic_0001>

<bundles_post_ra>
// kernel: tpu_custom_call.1
= control target key start
LH: loop header
LB: loop body
LE: loop exit
PB: predicated region body
PF: predicated region fallthrough
CT: control target
= control target key end

     0   :  { %s2441_s0 = inlined_call_operand.vmem [shape: s8[256,256], index: 0, kind: input, shape index: {}]   ;;  %s2442_s1 = inlined_call_operand.vmem [shape: bf16[256,128], index: 1, kind: input, shape index: {}]   ;;  %s2443_s2 = inlined_call_operand.hbm [shape: bf16[256,128], index: 2, kind: input, shape index: {}]   ;;  %s2444_s3 = inlined_call_operand.vmem [shape: f32[256,1], index: 3, kind: input, shape index: {}]   ;;  %s2445_s4 = inlined_call_operand.hbm [shape: f32[16,256], index: 4, kind: input, shape index: {}]   ;;  %s2446_s5 = inlined_call_operand.hbm [shape: bf16[256,128], index: 5, kind: input, shape index: {}]   ;;  %s2447_s6 = inlined_call_operand.vmem [shape: f32[1,128], index: 6, kind: input, shape index: {}]   ;;  %s2448_s7 = inlined_call_operand.hbm [shape: f32[2,16,128], index: 7, kind: output, shape index: {}]  }
   0x1   :  { %2461 = sst [smem:[#allocation23_spill]] %s2441_s0 }
   0x2   :  { %2462 = sst [smem:[#allocation24_spill]] %s2442_s1 }
   0x3   :  { %2463 = sst [smem:[#allocation25_spill]] %s2443_s2 }
   0x4   :  { %2464 = sst [smem:[#allocation26_spill]] %s2444_s3 }
   0x5   :  { %2465 = sst [smem:[#allocation27_spill]] %s2446_s5 }
   0x6   :  { %2466 = sst [smem:[#allocation28_spill]] %s2447_s6 }
   0x7   :  { %2467 = sst [smem:[#allocation29_spill]] %s2448_s7 }
   0x8   :  { %12 = vsyncpa [#allocation5], 0 }
   0x9   :  { %14 = vsyncpa [#allocation5 + $0x1], 0 }
   0xa   :  { %15 = vsyncpa [#allocation8], 0 }
   0xb   :  { %17 = vsyncpa [#allocation8 + $0x1], 0 }
   0xc   :  { %18 = vsyncpa [#allocation6], 0 }
   0xd   :  { %20 = vsyncpa [#allocation6 + $0x1], 0  ;;  %s2093_s24 = smov 0   ;;  %s2095_s25 = smov 0  }
   0xe   :  { %s2097_s26 = smov 0   ;;  %s2099_s27 = smov 0  }
   0xf   :  { %s2101_s28 = smov 0   ;;  %s2103_s29 = smov 0  }
  0x10   :  { %s2105_s30 = smov 0   ;;  %s2107_s8 = smov 0  }
  0x11   :  { %s2109_s9 = smov 0   ;;  %s2111_s10 = smov 0  }
  0x12 LB: > { %2468 = sst [smem:[#allocation15_spill]] %s2000_s24  ;;  %s2144_s11 = sadd.s32 4294967295, %s2036_s10   ;;  %s2036_s10 = sphi %s2111_s10, %s26_s10   ;;  %s2032_s9 = sphi %s2109_s9, %s2510_s9   ;;  %s2028_s8 = sphi %s2107_s8, %s2502_s8   ;;  %s2024_s30 = sphi %s2105_s30, %s2509_s30   ;;  %s2020_s29 = sphi %s2103_s29, %s2501_s29   ;;  %s2016_s28 = sphi %s2101_s28, %s2508_s28   ;;  %s2012_s27 = sphi %s2099_s27, %s2507_s27   ;;  %s2008_s26 = sphi %s2097_s26, %s2506_s26   ;;  %s2004_s25 = sphi %s2095_s25, %s2505_s25   ;;  %s2000_s24 = sphi %s2093_s24, %s2504_s24  }
  0x13   : > { %2469 = sst [smem:[#allocation16_spill]] %s2028_s8  ;;  %s1428_s12 = sadd.s32 4294967294, %s2036_s10  }
  0x14   : > { %s35_s13 = sadd.s32 1, %s2028_s8  ;;  %s38_s14 = sadd.s32 1, %s2032_s9 }
  0x15   : > { %p36_p0 = scmp.ge.s32.totalorder %s35_s13, 2  ;;  %s47_s15 = sadd.s32 1, %s2016_s28 }
  0x16   : > { %p54_p1 = scmp.ne.s32.totalorder %s2016_s28, %s2012_s27  ;;  %p55_p2 = scmp.eq.s32.totalorder %s2036_s10, 0 }
  0x17   : > { %s2512_s13 = smov (%p36_p0, %s35_s13), 0  ;;  %s2514_s14 = smov (!%p36_p0, %s38_s14), %s2032_s9 }
  0x18   : > { %2470 = sst [smem:[#allocation17_spill]] %s2512_s13  ;;  %s43_s16 = ssub.s32 %s2028_s8, %s2512_s13 }
  0x19   : > { %p2158_p3 = por %p55_p2, %p54_p1  ;;  %p40_p4 = scmp.ge.s32.totalorder %s2514_s14, 2 }
  0x1a   : > { %s99_s18 = sadd.s32 1, %s2008_s26  ;;  %p106_p5 = scmp.ne.s32.totalorder %s2008_s26, %s2004_s25 }
  0x1b   : > { %p112_p6 = scmp.ne.s32.totalorder %s2004_s25, %s2000_s24  ;;  %s2516_s14 = smov (%p40_p4, %s2514_s14), 0 }
  0x1c   : > { %2472 = sst [smem:[#allocation18_spill]] %s2516_s14  ;;  %p2172_p7 = por %p106_p5, %p55_p2 }
  0x1d   : > { %p2451_p8 = scmp.eq.s32.totalorder %s2144_s11, 0  ;;  %s42_s20 = ssub.s32 %s2032_s9, %s2516_s14 }
  0x1e   : > { %s2473_s19 = scalar_select %p2172_p7, 1, 0 }
  0x1f   : > { %p230_p9 = scmp.eq.s32.totalorder %s2144_s11, 3  ;;  %s44_s21 = sor.u32 %s43_s16, %s42_s20 }
  0x20   : > { %p97_p10 = scmp.eq.s32.totalorder %s42_s20, 0  ;;  %p45_p11 = scmp.eq.s32.totalorder %s44_s21, 0 }
  0x21   : > { %p2185_p12 = por %p2451_p8, %p112_p6  ;;  %p2198_p13 = por %p230_p9, %p106_p5 }
  0x22   : > { %s2190_s23 = scalar_select %p97_p10, %s2008_s26, %s99_s18  }
  0x23   : > { %s2474_s22 = scalar_select %p2185_p12, 1, 0 }
  0x24   : > { %2475 = sst [smem:[#allocation19_spill]] %s2190_s23  ;;  %p236_p0 = scmp.eq.s32.totalorder %s1428_s12, 3 }
  0x25   : > { %s2193_s13 = scalar_select %p45_p11, %s2016_s28, %s47_s15  }
  0x26   : > { %s2477_s7 = scalar_select %p2198_p13, 1, 0 }
  0x27   : > { %2476 = sst [smem:[#allocation20_spill]] %s2193_s13  ;;  %p1429_p1 = scmp.ge.s32.totalorder %s2036_s10, 1 }
  0x28   : > { %2478 = sst [smem:[#allocation21_spill]] %s2477_s7  ;;  %p243_p2 = scmp.lt.s32.totalorder %s2036_s10, 5 }
  0x29   : > { %p2207_p4 = por %p236_p0, %p112_p6  ;;  %s2038_s15 = smov [#allocation9]  }
  0x2a   : > { %p2211_p8 = pnand %p1429_p1, %p243_p2  ;;  %s255_s18 = sshll.u32 %s2038_s15, 4  ;;  %s256_s18 = int_to_ptr.vmem [resolvable:$true] %s255_s18 }
  0x2b   : > { %s2479_s16 = scalar_select %p2207_p4, 1, 0 }
  0x2c   : > { %p1701_p5 = pneg %p2211_p8  ;;  %p2482_p9 = scmp.eq.s32.totalorder %s2144_s11, 0 }
  0x2d   : > { %2480 = sst [smem:[#allocation22_spill]] %s2479_s16  ;;  %s1849_s12 = scalar_lea.vmem %s256_s18, 2048 }
  0x2e   : > { %p1702_p10 = pnand %p1701_p5, %p2482_p9  ;;  %p1850_p13 = scmp.ne.s32.totalorder %s256_s18, %s1849_s12 }
  0x2f   : > { %p1857_p0 = scmp.lt.s32.totalorder %s256_s18, %s256_s18  ;;  %p1858_p7 = scmp.lt.s32.totalorder %s1849_s12, %s1849_s12 }
  0x30   : > { %p1840_p11 = pneg %p1702_p10 }
  0x31   : > { %p1859_p4 = por %p1858_p7, %p1857_p0 }
  0x32   : > { %p1852_p12 = pnand %p1850_p13, %p1840_p11 }
  0x34   : > { %p1853_p6 = pneg %p1852_p12 }
  0x36   : > { %p1860_p1 = pnand %p1859_p4, %p1853_p6 }
  0x38   : > { %1863 = shalt.err (!%p1860_p1)
}
  0x39   : > { %s2039_s21 = smov 64   ;;  %s2040_s14 = smov 4  }
  0x3a   : > { %s2483_s5 = sld [smem:[#allocation27_spill]]  ;;  %p1431_p2 = scmp.ge.s32.totalorder %s2036_s10, 4 }
  0x3c   : > { %268 = sbr.rel (%p1431_p2) target bundleno = 111 (0x6f), region = 24 }
  0x40   : > { %1704 = dma.hbm_to_vmem [thread:$0]  (!%p1702_p10), %s2483_s5, 2048, %s256_s18, [#allocation8], %s2039_s21, %s2039_s21, %s2040_s14  }
  0x41   : > { %271 = sbr.rel (!%p2158_p3) target bundleno = 77 (0x4d), region = 28  ;;  %s273_s15 = sand.u32 (%p2158_p3), 1, %s2016_s28  }
  0x42   : > { %s1491_s12 = sshll.u32 (%p2158_p3), %s2032_s9, 3  ;;  %s1432_s16 = sshll.u32 (%p2158_p3), %s273_s15, 5 }
  0x43   : > { %s278_s24 = sadd.s32 (%p2158_p3), %s2028_s8, %s1491_s12  ;;  %s2484_s0 = sld [smem:[#allocation23_spill]] (%p2158_p3) }
  0x44   : > { %s1435_s7 = sshll.u32 (%p2158_p3), %s278_s24, 3  ;;  %s275_s13 = scalar_lea.vmem (%p2158_p3), [#allocation3], %s1432_s16 }
  0x49   : > { %s280_s1 = scalar_lea.vmem %s2484_s0, %s1435_s7 }
  0x4a   : > { %v315_v0 = vld [vmem:[%s280_s1] sm:$0xff]  ;;  %v317_v1 = vld [vmem:[%s280_s1 + $0x10] sm:$0xff] }
  0x4b   : > { %v319_v2 = vld [vmem:[%s280_s1 + $0x20] sm:$0xff]  ;;  %316 = vst [vmem:[%s275_s13] sm:$0xff] %v315_v0  ;;  %318 = vst [vmem:[%s275_s13 + $0x8] sm:$0xff] %v317_v1  ;;  %v321_v3 = vld [vmem:[%s280_s1 + $0x30] sm:$0xff] }
  0x4c   : > { %320 = vst [vmem:[%s275_s13 + $0x10] sm:$0xff] %v319_v2  ;;  %322 = vst [vmem:[%s275_s13 + $0x18] sm:$0xff] %v321_v3 }
  0x4d PF: > { %s338_s14 = sand.u32 1, %s2008_s26   ;;  %s1492_s17 = sshll.u32 %s2032_s9, 10 }
  0x4e   : > { %s1436_s24 = sshll.u32 %s338_s14, 6  ;;  %s2485_s2 = sld [smem:[#allocation25_spill]] }
  0x4f   : > { %s342_s6 = scalar_lea.vmem [#allocation4], %s1436_s24  ;;  %s339_s16 = scalar_lea.sflag [#allocation5], %s338_s14 }
  0x50   : > { %s349_s7 = sshll.u32 %s342_s6, 4  ;;  %p2486_p7 = scmp.ne.s32.totalorder %s2473_s19, 0  ;;  %s350_s7 = int_to_ptr.vmem [resolvable:$true] %s349_s7 }
  0x51   : > { %s1876_s21 = scalar_lea.vmem %s350_s7, 1024  ;;  %s2041_s1 = smov [#allocation4]  }
  0x52   : > { %p1877_p3 = scmp.ne.s32.totalorder %s350_s7, %s1876_s21  ;;  %s1880_s15 = sshll.u32 %s2041_s1, 4  ;;  %s1881_s15 = int_to_ptr.vmem [resolvable:$false] %s1880_s15 }
  0x53   : > { %s1882_s12 = scalar_lea.vmem %s1881_s15, 2048  ;;  %p1883_p4 = scmp.lt.s32.totalorder %s350_s7, %s1881_s15 }
  0x54   : > { %s348_s3 = scalar_lea.hbm %s2485_s2, %s1492_s17  ;;  %p1878_p12 = pnand %p1877_p3, %p2486_p7 }
  0x55   : > { %p1884_p5 = scmp.lt.s32.totalorder %s1882_s12, %s1876_s21 }
  0x56   : > { %p1879_p13 = pneg %p1878_p12 }
  0x57   : > { %p1885_p9 = por %p1884_p5, %p1883_p4 }
  0x59   : > { %p1886_p10 = pnand %p1885_p9, %p1879_p13 }
  0x5b   : > { %1889 = shalt.err (!%p1886_p10)
}
  0x5c   : > { %s2042_s13 = smov 64   ;;  %s2043_s17 = smov 4  }
  0x5d   : > { %1693 = dma.hbm_to_vmem [thread:$0]  (%p2486_p7), %s348_s3, 1024, %s350_s7, %s339_s16, %s2042_s13, %s2042_s13, %s2043_s17  }
  0x5e   : > { %s368_s24 = sand.u32 1, %s2036_s10   ;;  %s1439_s23 = sshll.u32 %s338_s14, 4 }
  0x5f   : > { %s1440_s18 = sshll.u32 %s2032_s9, 7  ;;  %s372_s6 = scalar_lea.vmem [#allocation7], %s1439_s23 }
  0x60   : > { %s378_s1 = sshll.u32 %s372_s6, 4  ;;  %s377_s21 = scalar_lea.hbm %s2445_s4, %s1440_s18  ;;  %s379_s1 = int_to_ptr.vmem [resolvable:$true] %s378_s1 }
  0x61   : > { %s369_s15 = scalar_lea.sflag [#allocation8], %s368_s24  ;;  %s1902_s12 = scalar_lea.vmem %s379_s1, 256 }
  0x62   : > { %p1903_p11 = scmp.ne.s32.totalorder %s379_s1, %s1902_s12  ;;  %s2044_s5 = smov [#allocation7]  }
  0x63   : > { %s1906_s8 = sshll.u32 %s2044_s5, 4  ;;  %s1907_s8 = int_to_ptr.vmem [resolvable:$false] %s1906_s8 }
  0x64   : > { %p1904_p6 = pnand %p1903_p11, %p2486_p7  ;;  %s1908_s3 = scalar_lea.vmem %s1907_s8, 512 }
  0x65   : > { %p1909_p1 = scmp.lt.s32.totalorder %s379_s1, %s1907_s8  ;;  %p1910_p2 = scmp.lt.s32.totalorder %s1908_s3, %s1902_s12 }
  0x66   : > { %p1905_p0 = pneg %p1904_p6 }
  0x67   : > { %p1911_p3 = por %p1910_p2, %p1909_p1 }
  0x69   : > { %p1912_p12 = pnand %p1911_p3, %p1905_p0 }
  0x6b   : > { %1915 = shalt.err (!%p1912_p12)
}
  0x6c   : > { %s2045_s14 = smov 256   ;;  %s2046_s0 = smov 128  }
  0x6d   : > { %s2047_s2 = smov 8  }
  0x6e   : > { %1694 = dma.hbm_to_vmem [thread:$0]  (%p2486_p7), %s377_s21, 256, %s379_s1, %s369_s15, %s2045_s14, %s2046_s0, %s2047_s2  }
  0x6f PF: > { %390 = sbr.rel (%p2211_p8) target bundleno = 1006 (0x3ee), region = 82  ;;  %s393_s5 = sand.u32 (!%p2211_p8), 1, %s2012_s27  }
  0x70   : > { %s2253_s7 = sand.u32 (!%p2211_p8), 1, %s2004_s25   ;;  %s1442_s8 = sshll.u32 (!%p2211_p8), %s393_s5, 5 }
  0x71   : > { %s1443_s16 = sshll.u32 (!%p2211_p8), %s2253_s7, 6  ;;  %s2256_s13 = scalar_lea.vmem (!%p2211_p8), [#allocation3], %s1442_s8 }
  0x72   : > { %s400_s17 = scalar_lea.sflag (!%p2211_p8), [#allocation5], %s2253_s7  ;;  %s2259_s24 = scalar_lea.vmem (!%p2211_p8), [#allocation4], %s1443_s16 }
  0x73   : > { %p2487_p7 = scmp.ne.s32.totalorder (!%p2211_p8), %s2474_s22, 0 }
  0x75   : > { %1983 = dma.done.wait (%p2487_p7), %s400_s17, 1024  }
  0x76   : > { %1985 = vsyncadd (%p2487_p7), %s400_s17, 4294966272  ;;  %s408_s27 = sand.u32 1, %s2144_s11   ;;  %s1444_s19 = sshll.u32 %s2253_s7, 4 }
  0x77   : > { %s409_s20 = scalar_lea.sflag [#allocation8], %s408_s27  ;;  %s2267_s23 = scalar_lea.vmem [#allocation7], %s1444_s19 }
  0x78   : > { %1987 = dma.done.wait (%p2487_p7), %s409_s20, 256  }
  0x79   : > { %1989 = vsyncadd (%p2487_p7), %s409_s20, 4294967040  ;;  %p2488_p8 = scmp.eq.s32.totalorder %s2144_s11, 0 }
  0x7b   : > { %1991 = dma.done.wait (%p2488_p8), [#allocation8], 2048   ;;  %p2489_p13 = pmov %p2488_p8 }
  0x7c   : > { %s1447_s18 = sshll.u32 %s2020_s29, 4  ;;  %s1449_s6 = sshll.u32 %s2024_s30, 4 }
  0x7d   : > { %1993 = vsyncadd (%p2489_p13), [#allocation8], 4294965248  ;;  %p468_p4 = scmp.lt.s32.totalorder %s1447_s18, 31  ;;  %p475_p5 = scmp.lt.s32.totalorder %s1449_s6, 31 }
  0x7e   : > { %s2490_s12 = sld [smem:[#allocation24_spill]]  ;;  %s2289_s5 = scalar_lea.vmem [#allocation10], %s1444_s19 }
  0x7f   : > { %s2518_s18 = smov (!%p468_p4, %s1447_s18), 31  ;;  %s2520_s6 = smov (!%p475_p5, %s1449_s6), 31 }
  0x80   : > { %s1448_s1 = sshll.u32 %s2518_s18, 2  ;;  %s1450_s3 = sshll.u32 %s2520_s6, 3 }
  0x81   : > { %s2491_s2 = sld [smem:[#allocation26_spill]]  ;;  %p1451_p9 = scmp.ne.s32.totalorder %s2020_s29, 0 }
  0x83   : > { %484 = sbr.rel (%p1451_p9) target bundleno = 145 (0x91), region = 102 }
  0x84   : > { %s2282_s22 = scalar_lea.vmem %s2490_s12, %s1448_s1 }
  0x87   : > { %s2287_s11 = scalar_lea.vmem %s2491_s2, %s1450_s3 }
  0x88   : > { %v2048_v4 = vmov 0.0  }
  0x89   : > { %485 = vst [vmem:[#allocation2 + $0x30] sm:$0xff] %v2048_v4  ;;  %486 = vst [vmem:[#allocation2] sm:$0xff] %v2048_v4 }
  0x8a   : > { %487 = vst [vmem:[#allocation2 + $0x58] sm:$0xff] %v2048_v4  ;;  %488 = vst [vmem:[#allocation2 + $0x18] sm:$0xff] %v2048_v4 }
  0x8b   : > { %489 = vst [vmem:[#allocation2 + $0x50] sm:$0xff] %v2048_v4  ;;  %490 = vst [vmem:[#allocation2 + $0x68] sm:$0xff] %v2048_v4 }
  0x8c   : > { %491 = vst [vmem:[#allocation2 + $0x8] sm:$0xff] %v2048_v4  ;;  %492 = vst [vmem:[#allocation2 + $0x48] sm:$0xff] %v2048_v4 }
  0x8d   : > { %493 = vst [vmem:[#allocation2 + $0x40] sm:$0xff] %v2048_v4  ;;  %494 = vst [vmem:[#allocation2 + $0x20] sm:$0xff] %v2048_v4 }
  0x8e   : > { %495 = vst [vmem:[#allocation2 + $0x10] sm:$0xff] %v2048_v4  ;;  %496 = vst [vmem:[#allocation2 + $0x38] sm:$0xff] %v2048_v4 }
  0x8f   : > { %497 = vst [vmem:[#allocation2 + $0x60] sm:$0xff] %v2048_v4  ;;  %498 = vst [vmem:[#allocation2 + $0x70] sm:$0xff] %v2048_v4 }
  0x90   : > { %499 = vst [vmem:[#allocation2 + $0x78] sm:$0xff] %v2048_v4  ;;  %500 = vst [vmem:[#allocation2 + $0x28] sm:$0xff] %v2048_v4 }
  0x91 PF: > { %v1804_v5 = vld [vmem:[%s2282_s22 + $0x38] sm:$0xff]   ;;  %v1805_v6 = vld [vmem:[%s2282_s22 + $0x30] sm:$0xff]   ;;  %v1806_v7 = vld [vmem:[%s2282_s22 + $0x28] sm:$0xff]   ;;  %p1460_p10 = scmp.ne.s32.totalorder %s2020_s29, 1 }
  0x92   : > { %1592 = vmatprep.subr.bf16.mxu0 %v1804_v5  ;;  %1659 = vmatprep.subr.bf16.mxu1 %v1804_v5  ;;  %v1807_v8 = vld [vmem:[%s2282_s22 + $0x20] sm:$0xff]   ;;  %v503_v10 = vld [vmem:[%s2256_s13 + $0x10] sm:$0xff]  ;;  %v1808_v13 = vld [vmem:[%s2282_s22 + $0x18] sm:$0xff]   ;;  %s2492_s16 = sld [smem:[#allocation28_spill]] (!%p1460_p10) }
  0x93   : > { %1593 = vmatpush3.bf16.msra.mxu0 %v1804_v5  ;;  %1667 = vmatpush3.bf16.msra.mxu1 %v1804_v5  ;;  %v501_v9 = vld [vmem:[%s2256_s13] sm:$0xff]  ;;  %v509_v12 = vunpack.c.l.s8.bf16 %v503_v10  ;;  %v1809_v14 = vld [vmem:[%s2282_s22 + $0x10] sm:$0xff]   ;;  %v1810_v15 = vld [vmem:[%s2282_s22 + $0x8] sm:$0xff]   ;;  %v510_v20 = vunpack.c.h.s8.bf16 %v503_v10 }
  0x94   : > { %1594 = vmatprep.subr.bf16.mxu0 %v1805_v6  ;;  %1660 = vmatprep.subr.bf16.mxu1 %v1805_v6  ;;  %v505_v11 = vunpack.c.l.s8.bf16 %v501_v9  ;;  %v1811_v16 = vld [vmem:[%s2282_s22] sm:$0xff]   ;;  %v502_v17 = vld [vmem:[%s2256_s13 + $0x8] sm:$0xff]  ;;  %v504_v18 = vld [vmem:[%s2256_s13 + $0x18] sm:$0xff]  ;;  %v506_v19 = vunpack.c.h.s8.bf16 %v501_v9 }
  0x95   : > { %1616 = vmatprep.mubr.bf16.mxu1 %v509_v12  ;;  %v507_v21 = vunpack.c.l.s8.bf16 %v502_v17  ;;  %v511_v22 = vunpack.c.l.s8.bf16 %v504_v18  ;;  %v508_v23 = vunpack.c.h.s8.bf16 %v502_v17  ;;  %v512_v24 = vunpack.c.h.s8.bf16 %v504_v18  ;;  %v515_v25 = vld [vmem:[#allocation2 + $0x58] sm:$0xff]  ;;  %v523_v26 = vld [vmem:[#allocation2 + $0x10] sm:$0xff]  ;;  %v521_v30 = vld [vmem:[#allocation2 + $0x40] sm:$0xff] }
  0x96   : > { %1608 = vmatprep.mubr.bf16.mxu0 %v505_v11  ;;  %v513_v29 = vld [vmem:[#allocation2 + $0x30] sm:$0xff]  ;;  %v516_v35 = vld [vmem:[#allocation2 + $0x18] sm:$0xff]  ;;  %v514_v41 = vld [vmem:[#allocation2] sm:$0xff] }
  0x97   : > { %1595 = vmatpush3.bf16.msra.mxu0 %v1805_v6  ;;  %1668 = vmatpush3.bf16.msra.mxu1 %v1805_v6  ;;  %v524_v36 = vld [vmem:[#allocation2 + $0x38] sm:$0xff]  ;;  %v522_v42 = vld [vmem:[#allocation2 + $0x20] sm:$0xff]  ;;  %v519_v47 = vld [vmem:[#allocation2 + $0x8] sm:$0xff] }
  0x98   : > { %1596 = vmatprep.subr.bf16.mxu0 %v1806_v7  ;;  %1661 = vmatprep.subr.bf16.mxu1 %v1806_v7  ;;  %v527_v48 = vld [vmem:[#allocation2 + $0x78] sm:$0xff]  ;;  %v517_v53 = vld [vmem:[#allocation2 + $0x50] sm:$0xff]  ;;  %v525_v54 = vld [vmem:[#allocation2 + $0x60] sm:$0xff] }
  0x99   : > { %v520_v59 = vld [vmem:[#allocation2 + $0x48] sm:$0xff]  ;;  %v526_v2 = vld [vmem:[#allocation2 + $0x70] sm:$0xff] }
  0x9a   : > { %v528_v60 = vld [vmem:[#allocation2 + $0x28] sm:$0xff] }
  0x9b   : > { %1597 = vmatpush3.bf16.msra.mxu0 %v1806_v7  ;;  %1669 = vmatpush3.bf16.msra.mxu1 %v1806_v7  ;;  %v518_v1 = vld [vmem:[#allocation2 + $0x68] sm:$0xff] }
  0x9c   : > { %1598 = vmatprep.subr.bf16.mxu0 %v1807_v8  ;;  %1662 = vmatprep.subr.bf16.mxu1 %v1807_v8 }
  0x9f   : > { %1599 = vmatpush3.bf16.msra.mxu0 %v1807_v8  ;;  %1670 = vmatpush3.bf16.msra.mxu1 %v1807_v8 }
  0xa0   : > { %1600 = vmatprep.subr.bf16.mxu0 %v1808_v13  ;;  %1663 = vmatprep.subr.bf16.mxu1 %v1808_v13 }
  0xa3   : > { %1601 = vmatpush3.bf16.msra.mxu0 %v1808_v13  ;;  %1671 = vmatpush3.bf16.msra.mxu1 %v1808_v13 }
  0xa4   : > { %1602 = vmatprep.subr.bf16.mxu0 %v1809_v14  ;;  %1664 = vmatprep.subr.bf16.mxu1 %v1809_v14 }
  0xa7   : > { %1603 = vmatpush3.bf16.msra.mxu0 %v1809_v14  ;;  %1672 = vmatpush3.bf16.msra.mxu1 %v1809_v14 }
  0xa8   : > { %1604 = vmatprep.subr.bf16.mxu0 %v1810_v15  ;;  %1665 = vmatprep.subr.bf16.mxu1 %v1810_v15 }
  0xab   : > { %1605 = vmatpush3.bf16.msra.mxu0 %v1810_v15  ;;  %1673 = vmatpush3.bf16.msra.mxu1 %v1810_v15 }
  0xac   : > { %1606 = vmatprep.subr.bf16.mxu0 %v1811_v16  ;;  %1666 = vmatprep.subr.bf16.mxu1 %v1811_v16 }
  0xaf   : > { %1607 = vmatpush3.bf16.msra.mxu0 %v1811_v16  ;;  %1674 = vmatpush3.bf16.msra.mxu1 %v1811_v16 }
  0xb2   : > { %1609 = vmatmul.mubr.bf16.vlgmr.msra.gmra.mxu0 %v506_v19  ;;  %1617 = vmatmul.mubr.bf16.vlgmr.msra.gmra.mxu1 %v510_v20 }
  0xb3   : > { %1612 = vmatprep.mubr.bf16.mxu0 %v507_v21  ;;  %1620 = vmatprep.mubr.bf16.mxu1 %v511_v22 }
  0xba   : > { %1613 = vmatmul.mubr.bf16.gmra.mxu0 %v508_v23  ;;  %1621 = vmatmul.mubr.bf16.gmra.mxu1 %v512_v24 }
 0x172   : > { %v1610_v27 = vpop.f32.mrf.mxu0  ;;  %v1618_v28 = vpop.f32.mrf.mxu1 }
 0x173   : > { %v692_v31 = vadd.f32 %v1610_v27, %v515_v25  ;;  %v700_v32 = vadd.f32 %v1618_v28, %v523_v26 }
 0x174   : > { %v627_v33 = vpop.f32.mrf.mxu0  ;;  %v659_v34 = vpop.f32.mrf.mxu1 }
 0x175   : > { %708 = vst [vmem:[#allocation2 + $0x58] sm:$0xff] %v692_v31  ;;  %716 = vst [vmem:[#allocation2 + $0x10] sm:$0xff] %v700_v32  ;;  %v690_v37 = vadd.f32 %v627_v33, %v513_v29  ;;  %v698_v38 = vadd.f32 %v659_v34, %v521_v30 }
 0x176   : > { %v1611_v39 = vpop.f32.mrf.mxu0  ;;  %v1619_v40 = vpop.f32.mrf.mxu1 }
 0x177   : > { %706 = vst [vmem:[#allocation2 + $0x30] sm:$0xff] %v690_v37  ;;  %714 = vst [vmem:[#allocation2 + $0x40] sm:$0xff] %v698_v38  ;;  %v693_v43 = vadd.f32 %v1611_v39, %v516_v35  ;;  %v701_v44 = vadd.f32 %v1619_v40, %v524_v36 }
 0x178   : > { %v630_v45 = vpop.f32.mrf.mxu0  ;;  %v662_v46 = vpop.f32.mrf.mxu1 }
 0x179   : > { %709 = vst [vmem:[#allocation2 + $0x18] sm:$0xff] %v693_v43  ;;  %717 = vst [vmem:[#allocation2 + $0x38] sm:$0xff] %v701_v44  ;;  %v691_v49 = vadd.f32 %v630_v45, %v514_v41  ;;  %v699_v50 = vadd.f32 %v662_v46, %v522_v42 }
 0x17a   : > { %v1614_v51 = vpop.f32.mrf.mxu0  ;;  %v1622_v52 = vpop.f32.mrf.mxu1 }
 0x17b   : > { %707 = vst [vmem:[#allocation2] sm:$0xff] %v691_v49  ;;  %715 = vst [vmem:[#allocation2 + $0x20] sm:$0xff] %v699_v50  ;;  %v696_v55 = vadd.f32 %v1614_v51, %v519_v47  ;;  %v704_v56 = vadd.f32 %v1622_v52, %v527_v48 }
 0x17c   : > { %v643_v57 = vpop.f32.mrf.mxu0  ;;  %v675_v58 = vpop.f32.mrf.mxu1 }
 0x17d   : > { %712 = vst [vmem:[#allocation2 + $0x8] sm:$0xff] %v696_v55  ;;  %720 = vst [vmem:[#allocation2 + $0x78] sm:$0xff] %v704_v56  ;;  %v694_v61 = vadd.f32 %v643_v57, %v517_v53  ;;  %v702_v62 = vadd.f32 %v675_v58, %v525_v54 }
 0x17e   : > { %v1615_v63 = vpop.f32.mrf.mxu0  ;;  %v1623_v0 = vpop.f32.mrf.mxu1 }
 0x17f   : > { %710 = vst [vmem:[#allocation2 + $0x50] sm:$0xff] %v694_v61  ;;  %718 = vst [vmem:[#allocation2 + $0x60] sm:$0xff] %v702_v62  ;;  %v697_v3 = vadd.f32 %v1615_v63, %v520_v59  ;;  %v705_v4 = vadd.f32 %v1623_v0, %v528_v60  ;;  %725 = sbr.rel (%p1460_p10) target bundleno = 979 (0x3d3), region = 106 }
 0x180   : > { %v646_v5 = vpop.f32.mrf.mxu0  ;;  %v678_v6 = vpop.f32.mrf.mxu1 }
 0x181   : > { %713 = vst [vmem:[#allocation2 + $0x48] sm:$0xff] %v697_v3  ;;  %721 = vst [vmem:[#allocation2 + $0x28] sm:$0xff] %v705_v4  ;;  %v695_v7 = vadd.f32 %v646_v5, %v518_v1  ;;  %v703_v8 = vadd.f32 %v678_v6, %v526_v2 }
 0x183   : > { %711 = vst [vmem:[#allocation2 + $0x68] sm:$0xff] %v695_v7  ;;  %719 = vst [vmem:[#allocation2 + $0x70] sm:$0xff] %v703_v8 }
 0x184   : > { %v752_v9 = vld [vmem:[%s2287_s11 + $0x50] sm:$0xff]  ;;  %v750_v10 = vld [vmem:[%s2287_s11 + $0x40] sm:$0xff]  ;;  %v2049_v11 = vmov 0   ;;  %v753_v12 = vld [vmem:[%s2287_s11 + $0x58] sm:$0xff] }
 0x185   : > { %1813 = vset.pattern.permute.xlu1 %v2049_v11  ;;  %1812 = vset.pattern.permute.xlu0 %v2049_v11  ;;  %v751_v13 = vld [vmem:[%s2287_s11 + $0x48] sm:$0xff]  ;;  %v742_v15 = vld [vmem:[%s2287_s11] sm:$0xff]  ;;  %v1814_v16 = vld [vmem:[#allocation9 + $0x78] sm:$0xff]  }
 0x186   : > { %810 = vperm.xlu1 %1813, %v752_v9   ;;  %800 = vperm.xlu0 %1812, %v750_v10   ;;  %v743_v14 = vld [vmem:[%s2287_s11 + $0x8] sm:$0xff]  ;;  %v1815_v17 = vld [vmem:[#allocation9 + $0x38] sm:$0xff]   ;;  %v1816_v18 = vld [vmem:[#allocation9 + $0x70] sm:$0xff]  }
 0x187   : > { %1675 = vmatprep.subr.bf16.mxu1 %v1814_v16  ;;  %1510 = vmatprep.subr.bf16.mxu0 %v1814_v16  ;;  %v755_v19 = vld [vmem:[%s2287_s11 + $0x68] sm:$0xff]  ;;  %v1817_v20 = vld [vmem:[#allocation9 + $0x30] sm:$0xff]   ;;  %v754_v21 = vld [vmem:[%s2287_s11 + $0x60] sm:$0xff] }
 0x188   : > { %1683 = vmatpush3.bf16.msra.mxu1 %v1815_v17  ;;  %1511 = vmatpush3.bf16.msra.mxu0 %v1815_v17  ;;  %v1818_v22 = vld [vmem:[#allocation9 + $0x68] sm:$0xff]   ;;  %v745_v23 = vld [vmem:[%s2287_s11 + $0x18] sm:$0xff]  ;;  %v744_v25 = vld [vmem:[%s2287_s11 + $0x10] sm:$0xff] }
 0x189   : > { %1676 = vmatprep.subr.bf16.mxu1 %v1816_v18  ;;  %1512 = vmatprep.subr.bf16.mxu0 %v1816_v18  ;;  %v1819_v24 = vld [vmem:[#allocation9 + $0x28] sm:$0xff]   ;;  %v1820_v26 = vld [vmem:[#allocation9 + $0x60] sm:$0xff]   ;;  %v757_v27 = vld [vmem:[%s2287_s11 + $0x78] sm:$0xff] }
 0x18a   : > { %815 = vperm.xlu1 %1813, %v753_v12   ;;  %805 = vperm.xlu0 %1812, %v751_v13   ;;  %v1821_v28 = vld [vmem:[#allocation9 + $0x20] sm:$0xff]   ;;  %v756_v29 = vld [vmem:[%s2287_s11 + $0x70] sm:$0xff]  ;;  %v1822_v30 = vld [vmem:[#allocation9 + $0x58] sm:$0xff]  }
 0x18b   : > { %v1823_v31 = vld [vmem:[#allocation9 + $0x18] sm:$0xff]   ;;  %v747_v32 = vld [vmem:[%s2287_s11 + $0x28] sm:$0xff]  ;;  %v746_v33 = vld [vmem:[%s2287_s11 + $0x20] sm:$0xff] }
 0x18c   : > { %1684 = vmatpush3.bf16.msra.mxu1 %v1817_v20  ;;  %1513 = vmatpush3.bf16.msra.mxu0 %v1817_v20  ;;  %v1824_v34 = vld [vmem:[#allocation9 + $0x50] sm:$0xff]   ;;  %v1830_v35 = vld [vmem:[%s2259_s24 + $0x20] sm:$0xff]   ;;  %v749_v38 = vld [vmem:[%s2287_s11 + $0x38] sm:$0xff] }
 0x18d   : > { %1677 = vmatprep.subr.bf16.mxu1 %v1818_v22  ;;  %1514 = vmatprep.subr.bf16.mxu0 %v1818_v22  ;;  %v1825_v36 = vld [vmem:[#allocation9 + $0x10] sm:$0xff]   ;;  %v1831_v37 = vld [vmem:[%s2259_s24] sm:$0xff]   ;;  %v1826_v40 = vld [vmem:[#allocation9 + $0x48] sm:$0xff]  }
 0x18e   : > { %765 = vperm.xlu1 %1813, %v743_v14   ;;  %760 = vperm.xlu0 %1812, %v742_v15   ;;  %v748_v39 = vld [vmem:[%s2287_s11 + $0x30] sm:$0xff]  ;;  %v1827_v41 = vld [vmem:[#allocation9 + $0x8] sm:$0xff]   ;;  %v1828_v42 = vld [vmem:[#allocation9 + $0x40] sm:$0xff]  }
 0x18f   : > { %1125 = vmatprep.mubr.bf16.mxu1 %v1830_v35  ;;  %1093 = vmatprep.mubr.bf16.mxu0 %v1831_v37  ;;  %v1829_v43 = vld [vmem:[#allocation9] sm:$0xff]   ;;  %v726_v53 = vld [vmem:[#allocation2 + $0x30] sm:$0xff]  ;;  %v1832_v54 = vld [vmem:[%s2259_s24 + $0x28] sm:$0xff]  }
 0x190   : > { %1685 = vmatpush3.bf16.msra.mxu1 %v1819_v24  ;;  %1515 = vmatpush3.bf16.msra.mxu0 %v1819_v24  ;;  %v734_v46 = vld [vmem:[#allocation2 + $0x40] sm:$0xff]  ;;  %v736_v56 = vld [vmem:[#allocation2 + $0x10] sm:$0xff]  ;;  %v737_v57 = vld [vmem:[#allocation2 + $0x38] sm:$0xff] }
 0x191   : > { %1678 = vmatprep.subr.bf16.mxu1 %v1820_v26  ;;  %1516 = vmatprep.subr.bf16.mxu0 %v1820_v26  ;;  %v735_v47 = vld [vmem:[#allocation2 + $0x20] sm:$0xff]  ;;  %v1833_v62 = vld [vmem:[%s2259_s24 + $0x8] sm:$0xff]   ;;  %v729_v4 = vld [vmem:[#allocation2 + $0x18] sm:$0xff] }
 0x192   : > { %825 = vperm.xlu1 %1813, %v755_v19   ;;  %820 = vperm.xlu0 %1812, %v754_v21   ;;  %v727_v52 = vld [vmem:[#allocation2] sm:$0xff]  ;;  %v728_v5 = vld [vmem:[#allocation2 + $0x58] sm:$0xff]  ;;  %v1834_v6 = vld [vmem:[%s2259_s24 + $0x30] sm:$0xff]  }
 0x193   : > { %v739_v8 = vld [vmem:[#allocation2 + $0x70] sm:$0xff]  ;;  %v738_v9 = vld [vmem:[#allocation2 + $0x60] sm:$0xff]  ;;  %v731_v20 = vld [vmem:[#allocation2 + $0x68] sm:$0xff] }
 0x194   : > { %1686 = vmatpush3.bf16.msra.mxu1 %v1821_v28  ;;  %1517 = vmatpush3.bf16.msra.mxu0 %v1821_v28  ;;  %v1835_v14 = vld [vmem:[%s2259_s24 + $0x10] sm:$0xff]   ;;  %v1836_v22 = vld [vmem:[%s2259_s24 + $0x38] sm:$0xff]   ;;  %v741_v24 = vld [vmem:[#allocation2 + $0x28] sm:$0xff] }
 0x195   : > { %1679 = vmatprep.subr.bf16.mxu1 %v1822_v30  ;;  %1518 = vmatprep.subr.bf16.mxu0 %v1822_v30  ;;  %v730_v21 = vld [vmem:[#allocation2 + $0x50] sm:$0xff]  ;;  %v1837_v30 = vld [vmem:[%s2259_s24 + $0x18] sm:$0xff]   ;;  %v733_v35 = vld [vmem:[#allocation2 + $0x48] sm:$0xff] }
 0x196   : > { %775 = vperm.xlu1 %1813, %v745_v23   ;;  %770 = vperm.xlu0 %1812, %v744_v25   ;;  %v740_v25 = vld [vmem:[#allocation2 + $0x78] sm:$0xff]  ;;  %v732_v37 = vld [vmem:[#allocation2 + $0x8] sm:$0xff] }
 0x198   : > { %1687 = vmatpush3.bf16.msra.mxu1 %v1823_v31  ;;  %1519 = vmatpush3.bf16.msra.mxu0 %v1823_v31 }
 0x199   : > { %1680 = vmatprep.subr.bf16.mxu1 %v1824_v34  ;;  %1520 = vmatprep.subr.bf16.mxu0 %v1824_v34 }
 0x19a   : > { %835 = vperm.xlu1 %1813, %v757_v27   ;;  %830 = vperm.xlu0 %1812, %v756_v29  }
 0x19c   : > { %1688 = vmatpush3.bf16.msra.mxu1 %v1825_v36  ;;  %1521 = vmatpush3.bf16.msra.mxu0 %v1825_v36 }
 0x19d   : > { %1681 = vmatprep.subr.bf16.mxu1 %v1826_v40  ;;  %1522 = vmatprep.subr.bf16.mxu0 %v1826_v40 }
 0x19e   : > { %785 = vperm.xlu1 %1813, %v747_v32   ;;  %780 = vperm.xlu0 %1812, %v746_v33  }
 0x1a0   : > { %1689 = vmatpush3.bf16.msra.mxu1 %v1827_v41  ;;  %1523 = vmatpush3.bf16.msra.mxu0 %v1827_v41 }
 0x1a1   : > { %1682 = vmatprep.subr.bf16.mxu1 %v1828_v42  ;;  %1524 = vmatprep.subr.bf16.mxu0 %v1828_v42  ;;  %v1174_v42 = vld [vmem:[%s2267_s23] sm:$0xff] }
 0x1a2   : > { %795 = vperm.xlu1 %1813, %v749_v38   ;;  %790 = vperm.xlu0 %1812, %v748_v39  }
 0x1a4   : > { %1690 = vmatpush3.bf16.msra.mxu1 %v1829_v43  ;;  %1525 = vmatpush3.bf16.msra.mxu0 %v1829_v43 }
 0x201   : > { %v811_v44 = vpop.permute.xlu1 %810  ;;  %v801_v45 = vpop.permute.xlu0 %800 }
 0x202   : > { %v846_v50 = vmul.f32 %v801_v45, %v734_v46  ;;  %v848_v63 = vmul.f32 %v811_v44, %v736_v56 }
 0x205   : > { %v816_v48 = vpop.permute.xlu1 %815  ;;  %v806_v49 = vpop.permute.xlu0 %805 }
 0x206   : > { %v847_v51 = vmul.f32 %v806_v49, %v735_v47  ;;  %v849_v0 = vmul.f32 %v816_v48, %v737_v57 }
 0x208   : > { %v858_v55 = vpack.c.bf16 %v847_v51, %v846_v50  ;;  %v859_v7 = vpack.c.bf16 %v849_v0, %v848_v63 }
 0x209   : > { %v766_v58 = vpop.permute.xlu1 %765  ;;  %v761_v59 = vpop.permute.xlu0 %760 }
 0x20a   : > { %v839_v60 = vmul.f32 %v766_v58, %v727_v52  ;;  %v838_v61 = vmul.f32 %v761_v59, %v726_v53  ;;  %1126 = vmatmul.mubr.bf16.vlgmr.msra.gmra.mxu1 %v858_v55 }
 0x20b   : > { %1133 = vmatprep.mubr.bf16.mxu1 %v1832_v54 }
 0x20c   : > { %v854_v1 = vpack.c.bf16 %v839_v60, %v838_v61 }
 0x20d   : > { %v826_v2 = vpop.permute.xlu1 %825  ;;  %v821_v3 = vpop.permute.xlu0 %820 }
 0x20e   : > { %1094 = vmatmul.mubr.bf16.vlgmr.msra.gmra.mxu0 %v854_v1  ;;  %v851_v15 = vmul.f32 %v826_v2, %v739_v8  ;;  %v850_v16 = vmul.f32 %v821_v3, %v738_v9 }
 0x20f   : > { %1101 = vmatprep.mubr.bf16.mxu0 %v1833_v62 }
 0x210   : > { %v860_v23 = vpack.c.bf16 %v851_v15, %v850_v16 }
 0x211   : > { %v776_v10 = vpop.permute.xlu1 %775  ;;  %v771_v11 = vpop.permute.xlu0 %770 }
 0x212   : > { %v841_v12 = vmul.f32 %v776_v10, %v729_v4  ;;  %v840_v13 = vmul.f32 %v771_v11, %v728_v5  ;;  %1134 = vmatmul.mubr.bf16.gmra.mxu1 %v859_v7  ;;  %v2347_v11 = vld [vmem:[%s2492_s16] ss:$0 sm:$0xff] }
 0x213   : > { %1141 = vmatprep.mubr.bf16.mxu1 %v1834_v6 }
 0x214   : > { %v855_v17 = vpack.c.bf16 %v841_v12, %v840_v13 }
 0x215   : > { %v836_v18 = vpop.permute.xlu1 %835  ;;  %v831_v19 = vpop.permute.xlu0 %830 }
 0x216   : > { %1102 = vmatmul.mubr.bf16.gmra.mxu0 %v855_v17  ;;  %v853_v31 = vmul.f32 %v836_v18, %v741_v24  ;;  %v852_v32 = vmul.f32 %v831_v19, %v740_v25 }
 0x217   : > { %1109 = vmatprep.mubr.bf16.mxu0 %v1835_v14 }
 0x218   : > { %v861_v38 = vpack.c.bf16 %v853_v31, %v852_v32 }
 0x219   : > { %v786_v26 = vpop.permute.xlu1 %785  ;;  %v781_v27 = vpop.permute.xlu0 %780 }
 0x21a   : > { %v843_v28 = vmul.f32 %v786_v26, %v731_v20  ;;  %v842_v29 = vmul.f32 %v781_v27, %v730_v21  ;;  %1142 = vmatmul.mubr.bf16.gmra.mxu1 %v860_v23 }
 0x21b   : > { %1149 = vmatprep.mubr.bf16.mxu1 %v1836_v22 }
 0x21c   : > { %v856_v33 = vpack.c.bf16 %v843_v28, %v842_v29 }
 0x21d   : > { %v796_v34 = vpop.permute.xlu1 %795  ;;  %v791_v36 = vpop.permute.xlu0 %790 }
 0x21e   : > { %1110 = vmatmul.mubr.bf16.gmra.mxu0 %v856_v33  ;;  %v845_v39 = vmul.f32 %v796_v34, %v733_v35  ;;  %v844_v40 = vmul.f32 %v791_v36, %v732_v37 }
 0x21f   : > { %1117 = vmatprep.mubr.bf16.mxu0 %v1837_v30 }
 0x220   : > { %v857_v41 = vpack.c.bf16 %v845_v39, %v844_v40 }
 0x222   : > { %1150 = vmatmul.mubr.bf16.gmra.mxu1 %v861_v38 }
 0x223   : > { %1656 = vmatprep.mubr.f32.mxu1 %v1174_v42 }
 0x226   : > { %1118 = vmatmul.mubr.bf16.gmra.mxu0 %v857_v41 }
 0x2ca   : > { %v1550_v43 = vpop.f32.mrf.mxu1 }
 0x2cc   : > { %v1551_v44 = vpop.f32.mrf.mxu1 }
 0x2cd   : > { %v1552_v27 = vadd.f32 %v1551_v44, %v1550_v43 }
 0x2ce   : > { %v2330_v45 = vpop.f32.mrf.mxu0  ;;  %v1553_v46 = vpop.f32.mrf.mxu1 }
 0x2cf   : > { %v1128_v33 = vadd.f32 %v1552_v27, %v2347_v11 }
 0x2d0   : > { %v2332_v47 = vpop.f32.mrf.mxu0  ;;  %v1554_v48 = vpop.f32.mrf.mxu1 }
 0x2d1   : > { %v1555_v23 = vadd.f32 %v1554_v48, %v1553_v46  ;;  %v1166_v39 = vmax.f32 %v1128_v33, 0.0 }
 0x2d2   : > { %v2334_v49 = vpop.f32.mrf.mxu0  ;;  %v1556_v50 = vpop.f32.mrf.mxu1 }
 0x2d3   : > { %v1131_v30 = vadd.f32 %v1555_v23, %v2347_v11 }
 0x2d4   : > { %v2336_v51 = vpop.f32.mrf.mxu0  ;;  %v1557_v52 = vpop.f32.mrf.mxu1 }
 0x2d5   : > { %v1558_v20 = vadd.f32 %v1557_v52, %v1556_v50  ;;  %v1167_v36 = vmax.f32 %v1131_v30, 0.0  ;;  %v1531_v52 = vadd.f32 %v2336_v51, %v2334_v49 }
 0x2d6   : > { %v2338_v53 = vpop.f32.mrf.mxu0  ;;  %v1559_v54 = vpop.f32.mrf.mxu1 }
 0x2d7   : > { %v1136_v28 = vadd.f32 %v1558_v20, %v2347_v11 }
 0x2d8   : > { %v2340_v55 = vpop.f32.mrf.mxu0  ;;  %v1560_v56 = vpop.f32.mrf.mxu1 }
 0x2d9   : > { %v1561_v16 = vadd.f32 %v1560_v56, %v1559_v54  ;;  %v1168_v34 = vmax.f32 %v1136_v28, 0.0  ;;  %v1534_v46 = vadd.f32 %v2340_v55, %v2338_v53  ;;  %v1099_v53 = vadd.f32 %v1531_v52, %v2347_v11 }
 0x2da   : > { %v2342_v57 = vpop.f32.mrf.mxu0  ;;  %v1562_v58 = vpop.f32.mrf.mxu1 }
 0x2db   : > { %v1139_v24 = vadd.f32 %v1561_v16, %v2347_v11 }
 0x2dc   : > { %v1536_v59 = vpop.f32.mrf.mxu0  ;;  %v1563_v60 = vpop.f32.mrf.mxu1 }
 0x2dd   : > { %v1564_v13 = vadd.f32 %v1563_v60, %v1562_v58  ;;  %v1169_v31 = vmax.f32 %v1139_v24, 0.0  ;;  %v1537_v42 = vadd.f32 %v1536_v59, %v2342_v57  ;;  %v1528_v57 = vadd.f32 %v2332_v47, %v2330_v45  ;;  %v1175_v47 = vld [vmem:[%s2267_s23 + $0x8] sm:$0xff] }
 0x2de   : > { %v1538_v61 = vpop.f32.mrf.mxu0  ;;  %v1565_v62 = vpop.f32.mrf.mxu1  ;;  %v1104_v58 = vadd.f32 %v1534_v46, %v2347_v11  ;;  %v1159_v60 = vmax.f32 %v1099_v53, 0.0 }
 0x2df   : > { %v1144_v21 = vadd.f32 %v1564_v13, %v2347_v11  ;;  %v1107_v54 = vadd.f32 %v1537_v42, %v2347_v11  ;;  %v1096_v49 = vadd.f32 %v1528_v57, %v2347_v11 }
 0x2e0   : > { %v1539_v63 = vpop.f32.mrf.mxu0  ;;  %v1566_v0 = vpop.f32.mrf.mxu1  ;;  %v1160_v51 = vmax.f32 %v1104_v58, 0.0 }
 0x2e1   : > { %v1567_v9 = vadd.f32 %v1566_v0, %v1565_v62  ;;  %v1170_v29 = vmax.f32 %v1144_v21, 0.0  ;;  %v1540_v40 = vadd.f32 %v1539_v63, %v1538_v61  ;;  %v1161_v55 = vmax.f32 %v1107_v54, 0.0 }
 0x2e2   : > { %v1541_v1 = vpop.f32.mrf.mxu0  ;;  %v1568_v2 = vpop.f32.mrf.mxu1  ;;  %v1158_v45 = vmax.f32 %v1096_v49, 0.0 }
 0x2e3   : > { %v1147_v17 = vadd.f32 %v1567_v9, %v2347_v11  ;;  %v1112_v48 = vadd.f32 %v1540_v40, %v2347_v11 }
 0x2e4   : > { %v1542_v3 = vpop.f32.mrf.mxu0  ;;  %v1569_v4 = vpop.f32.mrf.mxu1 }
 0x2e5   : > { %v1570_v7 = vadd.f32 %v1569_v4, %v1568_v2  ;;  %v1171_v25 = vmax.f32 %v1147_v17, 0.0  ;;  %v1543_v37 = vadd.f32 %v1542_v3, %v1541_v1  ;;  %v1162_v59 = vmax.f32 %v1112_v48, 0.0 }
 0x2e6   : > { %v1544_v5 = vpop.f32.mrf.mxu0  ;;  %v1571_v6 = vpop.f32.mrf.mxu1 }
 0x2e7   : > { %v1152_v14 = vadd.f32 %v1570_v7, %v2347_v11  ;;  %v1115_v43 = vadd.f32 %v1543_v37, %v2347_v11 }
 0x2e8   : > { %v1572_v8 = vpop.f32.mrf.mxu1  ;;  %v1545_v12 = vpop.f32.mrf.mxu0 }
 0x2e9   : > { %v1573_v10 = vadd.f32 %v1572_v8, %v1571_v6  ;;  %v1172_v22 = vmax.f32 %v1152_v14, 0.0  ;;  %v1546_v35 = vadd.f32 %v1545_v12, %v1544_v5  ;;  %v1163_v56 = vmax.f32 %v1115_v43, 0.0 }
 0x2ea   : > { %v1547_v19 = vpop.f32.mrf.mxu0 }
 0x2eb   : > { %v1155_v15 = vadd.f32 %v1573_v10, %v2347_v11  ;;  %v1120_v41 = vadd.f32 %v1546_v35, %v2347_v11 }
 0x2ec   : > { %v1548_v26 = vpop.f32.mrf.mxu0 }
 0x2ed   : > { %v1173_v18 = vmax.f32 %v1155_v15, 0.0  ;;  %v1549_v32 = vadd.f32 %v1548_v26, %v1547_v19  ;;  %v1164_v50 = vmax.f32 %v1120_v41, 0.0 }
 0x2ef   : > { %1624 = vmatprep.subr.mxu1 %v1173_v18  ;;  %v1123_v38 = vadd.f32 %v1549_v32, %v2347_v11 }
 0x2f0   : > { %1625 = vmatpush3.msra.mxu1 %v1173_v18 }
 0x2f1   : > { %1626 = vmatprep.subr.mxu1 %v1172_v22  ;;  %v1165_v44 = vmax.f32 %v1123_v38, 0.0 }
 0x2f2   : > { %1627 = vmatpush3.msra.mxu1 %v1172_v22 }
 0x2f3   : > { %1628 = vmatprep.subr.mxu1 %v1171_v25 }
 0x2f4   : > { %1629 = vmatpush3.msra.mxu1 %v1171_v25 }
 0x2f5   : > { %1630 = vmatprep.subr.mxu1 %v1170_v29 }
 0x2f6   : > { %1631 = vmatpush3.msra.mxu1 %v1170_v29 }
 0x2f7   : > { %1632 = vmatprep.subr.mxu1 %v1169_v31 }
 0x2f8   : > { %1633 = vmatpush3.msra.mxu1 %v1169_v31 }
 0x2f9   : > { %1634 = vmatprep.subr.mxu1 %v1168_v34 }
 0x2fa   : > { %1635 = vmatpush3.msra.mxu1 %v1168_v34 }
 0x2fb   : > { %1636 = vmatprep.subr.mxu1 %v1167_v36 }
 0x2fc   : > { %1637 = vmatpush3.msra.mxu1 %v1167_v36 }
 0x2fd   : > { %1638 = vmatprep.subr.mxu1 %v1166_v39 }
 0x2fe   : > { %1639 = vmatpush3.msra.mxu1 %v1166_v39 }
 0x2ff   : > { %1640 = vmatprep.subr.mxu1 %v1165_v44 }
 0x300   : > { %1641 = vmatpush3.msra.mxu1 %v1165_v44 }
 0x301   : > { %1642 = vmatprep.subr.mxu1 %v1164_v50 }
 0x302   : > { %1643 = vmatpush3.msra.mxu1 %v1164_v50 }
 0x303   : > { %1644 = vmatprep.subr.mxu1 %v1163_v56 }
 0x304   : > { %1645 = vmatpush3.msra.mxu1 %v1163_v56 }
 0x305   : > { %1646 = vmatprep.subr.mxu1 %v1162_v59 }
 0x306   : > { %1647 = vmatpush3.msra.mxu1 %v1162_v59 }
 0x307   : > { %1648 = vmatprep.subr.mxu1 %v1161_v55 }
 0x308   : > { %1649 = vmatpush3.msra.mxu1 %v1161_v55 }
 0x309   : > { %1650 = vmatprep.subr.mxu1 %v1160_v51 }
 0x30a   : > { %1651 = vmatpush3.msra.mxu1 %v1160_v51 }
 0x30b   : > { %1652 = vmatprep.subr.mxu1 %v1159_v60 }
 0x30c   : > { %1653 = vmatpush3.msra.mxu1 %v1159_v60 }
 0x30d   : > { %1654 = vmatprep.subr.mxu1 %v1158_v45 }
 0x30e   : > { %1655 = vmatpush3.msra.mxu1 %v1158_v45 }
 0x30f   : > { %1657 = vmatmul.mubr.f32.vlgmr.msra.gmra.mxu1 %v1175_v47 }
 0x3cf   : > { %v1658_v61 = vpop.f32.mrf.mxu1 }
 0x3d0   : > { %1252 = vst [vmem:[%s2289_s5 + $0x8] sm:$0xff] %v1658_v61 }
 0x3d1   : > { %v1242_v62 = vpop.f32.mrf.mxu1 }
 0x3d2   : > { %1251 = vst [vmem:[%s2289_s5] sm:$0xff] %v1242_v62 }
 0x3d3 PF: > { %s2493_s13 = sld [smem:[#allocation21_spill]]  ;;  %s1493_s17 = sshll.u32 %s2024_s30, 8 }
 0x3d4   : > { %s2494_s19 = sld [smem:[#allocation29_spill]]  ;;  %s1267_s18 = sshll.u32 %s2289_s5, 4  ;;  %s2382_s18 = int_to_ptr.vmem [resolvable:$true] %s1267_s18 }
 0x3d5   : > { %s1254_s23 = scalar_lea.sflag [#allocation6], %s2253_s7  ;;  %s1916_s6 = scalar_lea.vmem %s2382_s18, 256 }
 0x3d6   : > { %p1917_p11 = scmp.ne.s32.totalorder %s2382_s18, %s1916_s6  ;;  %s2050_s1 = smov [#allocation10]  }
 0x3d7   : > { %s1920_s21 = sshll.u32 %s2050_s1, 4  ;;  %s1921_s21 = int_to_ptr.vmem [resolvable:$false] %s1920_s21 }
 0x3d8   : > { %s1922_s30 = scalar_lea.vmem %s1921_s21, 512  ;;  %p1923_p2 = scmp.lt.s32.totalorder %s2382_s18, %s1921_s21 }
 0x3d9   : > { %p2495_p6 = scmp.ne.s32.totalorder %s2493_s13, 0  ;;  %p1924_p3 = scmp.lt.s32.totalorder %s1922_s30, %s1916_s6 }
 0x3da   : > { %s2379_s20 = scalar_lea.hbm %s2494_s19, %s1493_s17 }
 0x3db   : > { %p1918_p0 = pnand %p1917_p11, %p2495_p6  ;;  %p1925_p12 = por %p1924_p3, %p1923_p2 }
 0x3dd   : > { %p1919_p1 = pneg %p1918_p0 }
 0x3df   : > { %p1926_p7 = pnand %p1925_p12, %p1919_p1 }
 0x3e1   : > { %1929 = shalt.err (!%p1926_p7)
}
 0x3e2   : > { %s1930_s15 = scalar_lea.hbm %s2379_s20, 256  ;;  %s1934_s3 = scalar_lea.hbm %s2494_s19, 512 }
 0x3e3   : > { %p1931_p8 = scmp.ne.s32.totalorder %s2379_s20, %s1930_s15  ;;  %p1935_p5 = scmp.lt.s32.totalorder %s2379_s20, %s2494_s19 }
 0x3e4   : > { %p1936_p9 = scmp.lt.s32.totalorder %s1934_s3, %s1930_s15 }
 0x3e5   : > { %p1932_p13 = pnand %p1931_p8, %p2495_p6 }
 0x3e6   : > { %p1937_p10 = por %p1936_p9, %p1935_p5 }
 0x3e7   : > { %p1933_p4 = pneg %p1932_p13 }
 0x3e9   : > { %p1938_p11 = pnand %p1937_p10, %p1933_p4 }
 0x3eb   : > { %1941 = shalt.err (!%p1938_p11)
}
 0x3ec   : > { %s2051_s2 = smov 128   ;;  %s2052_s11 = smov 8  }
 0x3ed   : > { %1699 = dma.vmem_to_hbm [thread:$0]  (%p2495_p6), %s2382_s18, 256, %s2379_s20, %s1254_s23, %s2051_s2, %s2051_s2, %s2052_s11  }
 0x3ee PF: > { %s2496_s5 = sld [smem:[#allocation15_spill]]  ;;  %p1711_p0 = scmp.ge.s32.totalorder %s2036_s10, 2 }
 0x3ef   : > { %s2497_s29 = sld [smem:[#allocation22_spill]] }
 0x3f4   : > { %s1282_s8 = sand.u32 1, %s2496_s5  }
 0x3f5   : > { %p2498_p1 = scmp.ne.s32.totalorder %s2497_s29, 0  ;;  %s1283_s16 = scalar_lea.sflag [#allocation6], %s1282_s8 }
 0x3f7   : > { %p1706_p2 = pnand %p1711_p0, %p2498_p1 }
 0x3f9   : > { %p1707_p3 = pneg %p1706_p2 }
 0x3fb   : > { %1995 = dma.done.wait (%p1707_p3), %s1283_s16, 256  }
 0x3fc   : > { %1997 = vsyncadd (%p1707_p3), %s1283_s16, 4294967040  ;;  %s26_s10 = sadd.s32 1, %s2036_s10   ;;  %s2499_s13 = sld [smem:[#allocation19_spill]] }
 0x3fd   : > { %p23_p12 = scmp.ge.s32.totalorder %s26_s10, 6   ;;  %s2500_s7 = sld [smem:[#allocation20_spill]] }
 0x3fe   : > { %s2501_s29 = sld [smem:[#allocation16_spill]]  ;;  %s2504_s24 = smov %s2004_s25 }
 0x3ff   : > { %s2502_s8 = sld [smem:[#allocation17_spill]]  ;;  %s2505_s25 = smov %s2008_s26 }
 0x400   : > { %s2503_s17 = sld [smem:[#allocation18_spill]]  ;;  %s2507_s27 = smov %s2016_s28 }
 0x401   : > { %s2509_s30 = smov %s2032_s9 }
 0x402   : > { %s2506_s26 = smov %s2499_s13  ;;  %25 = sbr.rel (!%p23_p12) target bundleno = 18 (0x12), region = 170 }
 0x403   : > { %s2508_s28 = smov %s2500_s7 }
 0x406   : > { %s2510_s9 = smov %s2503_s17 }
 0x407   :  { %1288 = vsyncpa [#allocation5], 1 }
 0x408   :  { %1290 = vsyncpa [#allocation5 + $0x1], 1 }
 0x409   :  { %1291 = vsyncpa [#allocation8], 1 }
 0x40a   :  { %1293 = vsyncpa [#allocation8 + $0x1], 1 }
 0x40b   :  { %1294 = vsyncpa [#allocation6], 1 }
 0x40c   :  { %1296 = vsyncpa [#allocation6 + $0x1], 1 }

</bundles_post_ra>
